<compile_context>
chip_gen: v6e
topology: v6e:2x2x1
jax: 0.10.0
libtpu: 0.0.40
codegen_flags: <defaults>
</compile_context>

<pallas_src>
import functools
import math

import jax
import jax.numpy as jnp
from jax.experimental import pallas as pl
from jax.experimental.pallas import tpu as pltpu


def _cblinear_kernel(x_ref, w_ref, b_ref, *o_refs, c2s):
    # x_ref: (1, Cin, TL)   w_ref: (Cout, Cin)   b_ref: (Cout, 1)
    # o_refs[i]: (1, c2s[i], TL)
    x = x_ref[0]                                              # (Cin, TL)
    w = w_ref[...]                                            # (Cout, Cin)
    # Lane axis = spatial; K = Cin reduction on the MXU, f32 accumulate.
    acc = jnp.dot(w, x, preferred_element_type=jnp.float32)   # (Cout, TL)
    y = acc + b_ref[...].astype(jnp.float32)                  # bias bcast over lanes
    off = 0
    for o_ref, c2 in zip(o_refs, c2s):
        o_ref[0] = y[off:off + c2, :].astype(o_ref.dtype)
        off += c2


def _round_up(x, m):
    return (x + m - 1) // m * m


def _pick_lane_tile(l128, cin, cout, itemsize,
                    max_tile=4096, vmem_budget=24 * 1024 * 1024):
    """Largest multiple-of-128 lane tile whose double-buffered x/out tiles
    (plus resident weight & bias buffers) fit a conservative VMEM budget."""
    fixed = 2 * (cout * cin + cout) * 4          # w + b pipeline buffers (f32)
    tl = min(l128, max_tile)
    tl = max(_round_up(tl, 128) if tl % 128 else tl, 128)
    while tl > 128:
        per_step = 2 * cin * tl * itemsize + 2 * cout * tl * itemsize
        if fixed + per_step <= vmem_budget:
            break
        tl -= 128
    return max(tl, 128)


@functools.partial(jax.jit, static_argnames=("c2s",))
def cblinear_forward(x_nchw, weight, bias, c2s):
    """x_nchw: (N, C1, H, W); weight: (Cout, C1); bias: (Cout,).
    Returns a tuple of (N, c2, H, W) arrays (== torch.split along channels
    of the 1x1 conv output)."""
    N, C, H, W = x_nchw.shape
    Cout, Cin = weight.shape
    assert C == Cin and Cout == sum(c2s)
    L = H * W

    itemsize = jnp.dtype(x_nchw.dtype).itemsize
    TL = _pick_lane_tile(_round_up(L, 128), Cin, Cout, itemsize)
    # Pad L up to a multiple of TL so every grid step is a full block
    # (unmasked lane-dense stores, no partial edge blocks).
    Lp = _round_up(L, TL)

    # NCHW -> (N, C, H*W): contiguous view, no HBM transpose.
    x3 = x_nchw.reshape(N, C, L)
    if Lp != L:
        x3 = jnp.pad(x3, ((0, 0), (0, 0), (0, Lp - L)))

    grid = (N, Lp // TL)
    b2 = bias.reshape(Cout, 1)

    out_shapes = tuple(
        jax.ShapeDtypeStruct((N, c2, Lp), x_nchw.dtype) for c2 in c2s)
    out_specs = tuple(
        pl.BlockSpec((1, c2, TL), lambda n, l: (n, 0, l)) for c2 in c2s)

    flops = 2 * N * Lp * Cin * Cout
    bytes_accessed = ((N * Cin * Lp + N * Cout * Lp) * itemsize
                      + (Cout * Cin + Cout) * jnp.dtype(weight.dtype).itemsize)
    cost = pl.CostEstimate(flops=flops, transcendentals=0,
                           bytes_accessed=bytes_accessed)

    # VMEM limit: actual double-buffered working set + generous headroom,
    # capped below the v7x physical 64 MiB.
    working_set = (2 * (Cin + Cout) * TL * itemsize
                   + 2 * (Cout * Cin + Cout) * 4)
    vmem_limit = int(min(56 * 1024 * 1024,
                         max(32 * 1024 * 1024, 2 * working_set)))

    kernel = functools.partial(_cblinear_kernel, c2s=tuple(c2s))

    outs = pl.pallas_call(
        kernel,
        out_shape=out_shapes,
        grid_spec=pltpu.PrefetchScalarGridSpec(
            num_scalar_prefetch=0,
            grid=grid,
            in_specs=[
                pl.BlockSpec((1, Cin, TL), lambda n, l: (n, 0, l)),   # x tile
                pl.BlockSpec((Cout, Cin), lambda n, l: (0, 0)),       # weight (resident)
                pl.BlockSpec((Cout, 1), lambda n, l: (0, 0)),         # bias (resident)
            ],
            out_specs=out_specs,
        ),
        compiler_params=pltpu.CompilerParams(
            dimension_semantics=("parallel", "parallel"),
            vmem_limit_bytes=vmem_limit,
        ),
        cost_estimate=cost,
    )(x3, weight, b2)

    result = []
    for o, c2 in zip(outs, c2s):
        if Lp != L:
            o = o[:, :, :L]
        result.append(o.reshape(N, c2, H, W))
    return tuple(result)


class CBLinearPallas:
    """JAX/Pallas equivalent of CBLinear(c1, c2s) with k=1, s=1, p=0, g=1."""

    def __init__(self, c1, c2s, key):
        self.c1 = c1
        self.c2s = tuple(c2s)
        cout = sum(c2s)
        kw, kb = jax.random.split(key)
        # Deterministic init (kaiming-uniform-ish bound like PyTorch Conv2d).
        fan_in = c1 * 1 * 1
        bound = 1.0 / math.sqrt(fan_in)
        # Conv2d weight (cout, c1, 1, 1) stored squeezed as (cout, c1).
        self.weight = jax.random.uniform(
            kw, (cout, c1), jnp.float32, minval=-bound, maxval=bound)
        self.bias = jax.random.uniform(
            kb, (cout,), jnp.float32, minval=-bound, maxval=bound)

    def __call__(self, x_nchw):
        N, C, H, W = x_nchw.shape
        assert C == self.c1
        return cblinear_forward(x_nchw, self.weight, self.bias, self.c2s)


def _reference(x_nchw, w, b, c2s):
    # Pure-JAX reference: 1x1 conv == einsum over channels.  w is (Cout, Cin).
    y = jnp.einsum("nchw,dc->ndhw", x_nchw, w) + b[None, :, None, None]
    outs, off = [], 0
    for c2 in c2s:
        outs.append(y[:, off:off + c2, :, :])
        off += c2
    return tuple(outs)


if __name__ == "__main__":
    key = jax.random.PRNGKey(0)
    kx, kp = jax.random.split(key)

    # Small shapes consistent with the module: batch=2, c1=4, spatial=16x16,
    # split sizes c2s=(8, 16)  => conv output channels = 24.
    N, C1, H, W = 2, 4, 16, 16
    c2s = (8, 16)

    x = jax.random.normal(kx, (N, C1, H, W), jnp.float32)

    mod = CBLinearPallas(C1, c2s, kp)
    outs = mod(x)
    outs = jax.block_until_ready(outs)

    # sanity check against pure-JAX reference
    refs = _reference(x, mod.weight, mod.bias, c2s)
    for o, r, c2 in zip(outs, refs, c2s):
        assert o.shape == (N, c2, H, W), o.shape
        assert jnp.allclose(o, r, atol=1e-5, rtol=1e-5)

    print("KERNEL_OK")
</pallas_src>

<mosaic_0001>
module attributes {stable_mosaic.version = 11 : i64} {
  func.func @_cblinear_kernel(%arg0: i32, %arg1: i32, %arg2: memref<1x4x256xf32, #tpu.memory_space<vmem>>, %arg3: memref<24x4xf32, #tpu.memory_space<vmem>>, %arg4: memref<24x1xf32, #tpu.memory_space<vmem>>, %arg5: memref<1x8x256xf32, #tpu.memory_space<vmem>>, %arg6: memref<1x16x256xf32, #tpu.memory_space<vmem>>) attributes {dimension_semantics = [#tpu.dimension_semantics<parallel>, #tpu.dimension_semantics<parallel>], iteration_bounds = array<i64: 2, 1>, scalar_prefetch = 0 : i64, scratch_operands = 0 : i64, tpu.core_type = #tpu.core_type<tc>, window_params = [{transform_indices = @transform_0, window_bounds = array<i64: 1, 4, 256>}, {pipeline_mode = #tpu.pipeline_mode<synchronous>, transform_indices = @transform_1, window_bounds = array<i64: 24, 4>}, {pipeline_mode = #tpu.pipeline_mode<synchronous>, transform_indices = @transform_2, window_bounds = array<i64: 24, 1>}, {transform_indices = @transform_3, window_bounds = array<i64: 1, 8, 256>}, {transform_indices = @transform_4, window_bounds = array<i64: 1, 16, 256>}]} {
    %c0 = arith.constant 0 : index
    %c0_0 = arith.constant 0 : index
    %c0_1 = arith.constant 0 : index
    %0 = vector.load %arg2[%c0, %c0_0, %c0_1] : memref<1x4x256xf32, #tpu.memory_space<vmem>>, vector<1x4x256xf32>
    %1 = vector.shape_cast %0 : vector<1x4x256xf32> to vector<4x256xf32>
    %c0_2 = arith.constant 0 : index
    %c0_3 = arith.constant 0 : index
    %2 = vector.load %arg3[%c0_2, %c0_3] : memref<24x4xf32, #tpu.memory_space<vmem>>, vector<24x4xf32>
    %cst = arith.constant dense<0.000000e+00> : vector<24x256xf32>
    %3 = tpu.matmul %2, %1, %cst {dimension_numbers = #tpu.dot_dimension_numbers<[1], [0], [0], [1], [0, 0, 1, 1], [], []>} : vector<24x4xf32>, vector<4x256xf32>, vector<24x256xf32> -> vector<24x256xf32>
    %c0_4 = arith.constant 0 : index
    %c0_5 = arith.constant 0 : index
    %4 = vector.load %arg4[%c0_4, %c0_5] : memref<24x1xf32, #tpu.memory_space<vmem>>, vector<24x1xf32>
    %5 = vector.broadcast %4 : vector<24x1xf32> to vector<24x256xf32>
    %6 = arith.addf %3, %5 : vector<24x256xf32>
    %7 = vector.extract_strided_slice %6 {offsets = [0, 0], sizes = [8, 256], strides = [1, 1]} : vector<24x256xf32> to vector<8x256xf32>
    %c0_6 = arith.constant 0 : index
    %c0_7 = arith.constant 0 : index
    %c0_8 = arith.constant 0 : index
    %8 = vector.load %arg5[%c0_6, %c0_7, %c0_8] : memref<1x8x256xf32, #tpu.memory_space<vmem>>, vector<1x8x256xf32>
    %9 = vector.shape_cast %8 : vector<1x8x256xf32> to vector<8x256xf32>
    %10 = vector.shape_cast %7 : vector<8x256xf32> to vector<1x8x256xf32>
    tpu.vector_store %arg5[%c0_6, %c0_7, %c0_8], %10 {strides = array<i32>} : memref<1x8x256xf32, #tpu.memory_space<vmem>>, vector<1x8x256xf32>,
    %11 = vector.extract_strided_slice %6 {offsets = [8, 0], sizes = [16, 256], strides = [1, 1]} : vector<24x256xf32> to vector<16x256xf32>
    %c0_9 = arith.constant 0 : index
    %c0_10 = arith.constant 0 : index
    %c0_11 = arith.constant 0 : index
    %12 = vector.load %arg6[%c0_9, %c0_10, %c0_11] : memref<1x16x256xf32, #tpu.memory_space<vmem>>, vector<1x16x256xf32>
    %13 = vector.shape_cast %12 : vector<1x16x256xf32> to vector<16x256xf32>
    %14 = vector.shape_cast %11 : vector<16x256xf32> to vector<1x16x256xf32>
    tpu.vector_store %arg6[%c0_9, %c0_10, %c0_11], %14 {strides = array<i32>} : memref<1x16x256xf32, #tpu.memory_space<vmem>>, vector<1x16x256xf32>,
    return
  }
  func.func @transform_0(%arg0: i32, %arg1: i32) -> (i32, i32, i32) {
    %c0_i32 = arith.constant 0 : i32
    %c0_i32_0 = arith.constant 0 : i32
    return %arg0, %c0_i32, %arg1 : i32, i32, i32
  }
  func.func @transform_1(%arg0: i32, %arg1: i32) -> (i32, i32) {
    %c0_i32 = arith.constant 0 : i32
    %c0_i32_0 = arith.constant 0 : i32
    %c0_i32_1 = arith.constant 0 : i32
    return %c0_i32, %c0_i32_0 : i32, i32
  }
  func.func @transform_2(%arg0: i32, %arg1: i32) -> (i32, i32) {
    %c0_i32 = arith.constant 0 : i32
    %c0_i32_0 = arith.constant 0 : i32
    %c0_i32_1 = arith.constant 0 : i32
    return %c0_i32, %c0_i32_0 : i32, i32
  }
  func.func @transform_3(%arg0: i32, %arg1: i32) -> (i32, i32, i32) {
    %c0_i32 = arith.constant 0 : i32
    %c0_i32_0 = arith.constant 0 : i32
    return %arg0, %c0_i32, %arg1 : i32, i32, i32
  }
  func.func @transform_4(%arg0: i32, %arg1: i32) -> (i32, i32, i32) {
    %c0_i32 = arith.constant 0 : i32
    %c0_i32_0 = arith.constant 0 : i32
    return %arg0, %c0_i32, %arg1 : i32, i32, i32
  }
}

</mosaic_0001>

<bundles_post_ra>
// kernel: cblinear_forward.1
= control target key start
LH: loop header
LB: loop body
LE: loop exit
PB: predicated region body
PF: predicated region fallthrough
CT: control target
= control target key end

     0   :  { %s629_s15 = smov 0   ;;  %s631_s16 = smov 0   ;;  %s688_s0 = inlined_call_operand.vmem [shape: f32[2,4,256], index: 0, kind: input, shape index: {}]   ;;  %s689_s1 = inlined_call_operand.vmem [shape: f32[24,4], index: 1, kind: input, shape index: {}]   ;;  %s690_s2 = inlined_call_operand.vmem [shape: f32[24,1], index: 2, kind: input, shape index: {}]   ;;  %s691_s3 = inlined_call_operand.vmem [shape: f32[2,8,256], index: 3, kind: output, shape index: {0}]   ;;  %s692_s4 = inlined_call_operand.vmem [shape: f32[2,16,256], index: 4, kind: output, shape index: {1}]  }
   0x1   :  { %s633_s17 = smov 0  }
   0x2 LB: > { %s27_s18 = sadd.s32 1, %s596_s16  ;;  %p530_p0 = scmp.ge.s32.totalorder %s600_s17, 1  ;;  %s600_s17 = sphi %s633_s17, %s15_s17   ;;  %s596_s16 = sphi %s631_s16, %s694_s16   ;;  %s592_s15 = sphi %s629_s15, %s693_s15  }
   0x3   : > { %p29_p1 = scmp.ge.s32.totalorder %s27_s18, 2  ;;  %p188_p2 = scmp.lt.s32.totalorder %s600_s17, 3 }
   0x5   : > { %s696_s18 = smov (%p29_p1, %s27_s18), 0  ;;  %p189_p3 = pnand %p530_p0, %p188_p2 }
   0x6   : > { %p232_p4 = scmp.lt.s32.totalorder (!%p189_p3), %s592_s15, 1 }
   0x7   : > { %192 = sbr.rel (%p189_p3) target bundleno = 223 (0xdf), region = 32 }
   0xc   : > { %v602_v0 = vmov 0.0   ;;  %v265_v1 = vld [vmem:[%s690_s2] sm:$0xff]  ;;  %s698_s15 = smov (!%p232_p4, %s592_s15), 1  ;;  %v603_v2 = vmov 0   ;;  %v267_v3 = vld [vmem:[%s690_s2 + $0x10] sm:$0xff]  ;;  %v266_v4 = vld [vmem:[%s690_s2 + $0x8] sm:$0xff] }
   0xd   : > { %364 = vmatprep.mubr.f32.mxu0 %v602_v0  ;;  %370 = vmatprep.mubr.f32.mxu1 %v602_v0  ;;  %s544_s23 = sshll.u32 %s698_s15, 3  ;;  %vm295_vm0 = vcmask 1043456   ;;  %v262_v7 = vld [vmem:[%s689_s1] sm:$0xff]  ;;  %vm285_vm1 = vcmask 31744   ;;  %v263_v8 = vld [vmem:[%s689_s1 + $0x8] sm:$0xff]  ;;  %v264_v9 = vld [vmem:[%s689_s1 + $0x10] sm:$0xff] }
   0xe   : > { %575 = vset.pattern.permute.xlu0 %v603_v2  ;;  %576 = vset.pattern.permute.xlu1 %v603_v2  ;;  %s239_s28 = scalar_lea.vmem %s688_s0, %s544_s23  ;;  %s545_s9 = sshll.u32 %s698_s15, 4 }
   0xf   : > { %270 = vperm.xlu0 %575, %v265_v1   ;;  %280 = vperm.xlu1 %576, %v267_v3   ;;  %v261_v5 = vld [vmem:[%s239_s28] sm:$0xff]  ;;  %s546_s10 = sshll.u32 %s698_s15, 5  ;;  %s249_s13 = scalar_lea.vmem %s691_s3, %s545_s9 }
  0x10   : > { %v284_v6 = vcombine.high %v261_v5, %v261_v5  ;;  %s259_s20 = scalar_lea.vmem %s692_s4, %s546_s10 }
  0x12   : > { %537 = vmatprep.subr.msk.mxu0 %vm295_vm0, %v284_v6  ;;  %547 = vmatprep.subr.msk.mxu1 %vm295_vm0, %v284_v6 }
  0x13   : > { %275 = vperm.xlu0 %575, %v266_v4   ;;  %538 = vmatpush1.msk.msra.mxu0 %vm295_vm0, %v261_v5 }
  0x14   : > { %548 = vmatpush1.msk.msra.mxu1 %vm295_vm0, %v261_v5  ;;  %539 = vmatmul.mubr.msk.f32.vlgmr.msra.gmra.mxu0 %vm285_vm1, %v262_v7 }
  0x15   : > { %540 = vmatmul.mubr.msk.f32.vlgmr.msra.gmra.mxu1 %vm285_vm1, %v263_v8 }
  0x16   : > { %376 = vmatprep.mubr.f32.mxu1 %v602_v0 }
  0x19   : > { %541 = vmatmul.mubr.msk.f32.gmra.mxu1 %vm285_vm1, %v264_v9 }
  0x8a   : > { %v271_v10 = vpop.permute.xlu0 %270  ;;  %v281_v16 = vpop.permute.xlu1 %280 }
  0x8e   : > { %v276_v11 = vpop.permute.xlu0 %275 }
  0xd4   : > { %v366_v12 = vpop.f32.mrf.mxu0 }
  0xd5   : > { %v372_v13 = vpop.f32.mrf.mxu1  ;;  %v367_v14 = vadd.f32 %v366_v12, %v271_v10 }
  0xd6   : > { %v373_v15 = vadd.f32 %v372_v13, %v276_v11  ;;  %v368_v17 = vpop.f32.mrf.mxu0 }
  0xd7   : > { %v374_v18 = vpop.f32.mrf.mxu1  ;;  %383 = vst [vmem:[%s249_s13] sm:$0xff] %v367_v14  ;;  %v369_v19 = vadd.f32 %v368_v17, %v271_v10 }
  0xd8   : > { %385 = vst [vmem:[%s259_s20] sm:$0xff] %v373_v15  ;;  %v375_v20 = vadd.f32 %v374_v18, %v276_v11 }
  0xd9   : > { %v378_v21 = vpop.f32.mrf.mxu1  ;;  %384 = vst [vmem:[%s249_s13 + $0x8] sm:$0xff] %v369_v19 }
  0xda   : > { %386 = vst [vmem:[%s259_s20 + $0x8] sm:$0xff] %v375_v20  ;;  %v379_v22 = vadd.f32 %v378_v21, %v281_v16 }
  0xdb   : > { %v380_v23 = vpop.f32.mrf.mxu1 }
  0xdc   : > { %387 = vst [vmem:[%s259_s20 + $0x10] sm:$0xff] %v379_v22  ;;  %v381_v24 = vadd.f32 %v380_v23, %v281_v16 }
  0xde   : > { %388 = vst [vmem:[%s259_s20 + $0x18] sm:$0xff] %v381_v24 }
  0xdf PF: > { %s15_s17 = sadd.s32 1, %s600_s17   ;;  %s693_s15 = smov %s596_s16 }
  0xe0   : > { %p12_p5 = scmp.ge.s32.totalorder %s15_s17, 4   ;;  %s694_s16 = smov %s696_s18 }
  0xe2   :  { %14 = sbr.rel (!%p12_p5) target bundleno = 2 (0x2), region = 74 }

</bundles_post_ra>
